<compile_context>
chip_gen: v6e
topology: v6e:2x2x1
jax: 0.10.0
libtpu: 0.0.40
codegen_flags: <defaults>
</compile_context>

<pallas_src>
import functools

import jax
import jax.numpy as jnp
import numpy as np
from jax.experimental import pallas as pl
from jax.experimental.pallas import tpu as pltpu

LANE = 128
SUBLANE = 8
MAX_BLOCK_ROWS = 512      # 512 sublane-rows x 128 lanes = 65536 points per grid step
NUM_PARALLEL = 2          # leading "parallel" grid axis (uses both TCs on v7x)
NCH = 4                   # packed per-point channels: [depth, u, v, camera_idx]
NCAM_COLS = 15            # per-camera SMEM record: [1/f, cx, cy, r00..r22, tx, ty, tz]


def _cdiv(a, b):
    return (a + b - 1) // b


def _round_up(a, b):
    return _cdiv(a, b) * b


# ----------------------------- Pallas kernel --------------------------------
def floor_term_kernel(plane_ref, cam_ref, data_ref, out_ref,
                      *, num_cameras, block_rows):
    """plane_ref: SMEM (4,) f32; cam_ref: SMEM (C*15,) f32 (flat per-camera records);
       data_ref: VMEM (4, block_rows, 128) f32;
       out_ref:  VMEM (1, 8, 128) f32 resident partial-sum block (per parallel index)."""
    s = pl.program_id(1)

    @pl.when(s == 0)
    def _init():
        out_ref[...] = jnp.zeros_like(out_ref)

    d = data_ref[0]        # depth
    u = data_ref[1]        # pixel x
    v = data_ref[2]        # pixel y
    cam_id = data_ref[3]   # camera index (stored as f32; padded tail = -1)

    a = plane_ref[0]
    b = plane_ref[1]
    c3 = plane_ref[2]
    d0 = plane_ref[3]

    # Per camera c (all scalars from SMEM, folded once per grid step):
    #   local = [(u-cx)/f*d, (v-cy)/f*d, d],  world = R_c @ local + t_c
    #   dist  = n . world + d0 = (R_c^T n) . local + (n . t_c + d0)
    #         = d * (m0*u + m1*v + m2') + off
    #   with m0,m1 pre-scaled by 1/f and cx,cy folded into m2'.
    dist = jnp.zeros_like(d)
    for c in range(num_cameras):
        base = c * NCAM_COLS
        inv_f = cam_ref[base + 0]
        cxc = cam_ref[base + 1]
        cyc = cam_ref[base + 2]
        r00, r01, r02 = cam_ref[base + 3], cam_ref[base + 4], cam_ref[base + 5]
        r10, r11, r12 = cam_ref[base + 6], cam_ref[base + 7], cam_ref[base + 8]
        r20, r21, r22 = cam_ref[base + 9], cam_ref[base + 10], cam_ref[base + 11]
        tx, ty, tz = cam_ref[base + 12], cam_ref[base + 13], cam_ref[base + 14]

        m0 = (a * r00 + b * r10 + c3 * r20) * inv_f
        m1 = (a * r01 + b * r11 + c3 * r21) * inv_f
        m2 = (a * r02 + b * r12 + c3 * r22) - m0 * cxc - m1 * cyc
        off = a * tx + b * ty + c3 * tz + d0

        dist_c = d * (m0 * u + m1 * v + m2) + off
        # Padded points carry cam_id == -1 -> never selected -> contribute 0.
        dist = jnp.where(cam_id == jnp.float32(c), dist_c, dist)

    sq = dist * dist

    # Reduce (block_rows, 128) -> one (8, 128) vreg via sublane-aligned slice adds,
    # then accumulate into the resident output block.
    partial = sq[0:SUBLANE, :]
    for j in range(1, block_rows // SUBLANE):
        partial = partial + sq[j * SUBLANE:(j + 1) * SUBLANE, :]
    out_ref[0] += partial


# ----------------------------- wrapper / packing ------------------------------
def plan_layout(n, max_block_rows=MAX_BLOCK_ROWS, num_parallel=NUM_PARALLEL):
    """Choose (block_rows, steps, num_parallel, total_rows) for N points."""
    rows = _round_up(_cdiv(n, LANE), SUBLANE)
    rows_per_core = _round_up(_cdiv(rows, num_parallel), SUBLANE)
    block_rows = min(max_block_rows, rows_per_core)
    steps = _cdiv(rows_per_core, block_rows)
    total_rows = num_parallel * steps * block_rows
    return block_rows, steps, num_parallel, total_rows


def pack_point_data(depths, points, camera_idxs, total_rows):
    """Pack per-point data channels-first: (4, total_rows, 128).

    Floor pixels are static per FloorTerm instance, so this packing can be done once
    at init and reused for every forward call.
    """
    n = depths.shape[0]
    chans = jnp.stack(
        [depths, points[:, 0], points[:, 1], camera_idxs.astype(jnp.float32)],
        axis=0).astype(jnp.float32)                        # (4, N)
    n_pad = total_rows * LANE
    # Pad with -1: padded camera_idx never matches a real camera -> zero contribution,
    # so no in-kernel tail mask is needed.
    chans = jnp.pad(chans, ((0, 0), (0, n_pad - n)), constant_values=-1.0)
    return chans.reshape(NCH, total_rows, LANE)


def pack_camera_table(f, cx, cy, R, t):
    """Flat per-camera SMEM table: [1/f, cx, cy, r00..r22, tx, ty, tz] per camera -> (C*15,)."""
    cols = [1.0 / f, cx, cy,
            R[:, 0, 0], R[:, 0, 1], R[:, 0, 2],
            R[:, 1, 0], R[:, 1, 1], R[:, 1, 2],
            R[:, 2, 0], R[:, 2, 1], R[:, 2, 2],
            t[:, 0], t[:, 1], t[:, 2]]
    return jnp.stack(cols, axis=1).astype(jnp.float32).reshape(-1)


def floor_term_pallas(plane, cam_table_flat, data_packed, *, n_valid, block_rows,
                      steps, num_parallel):
    nch, total_rows, lane = data_packed.shape
    assert nch == NCH and lane == LANE
    assert total_rows == num_parallel * steps * block_rows
    num_cameras = cam_table_flat.shape[0] // NCAM_COLS

    kernel = functools.partial(
        floor_term_kernel,
        num_cameras=num_cameras,
        block_rows=block_rows)

    partials = pl.pallas_call(
        kernel,
        out_shape=jax.ShapeDtypeStruct((num_parallel, SUBLANE, LANE), jnp.float32),
        grid_spec=pltpu.PrefetchScalarGridSpec(
            num_scalar_prefetch=2,                    # plane + camera table -> SMEM
            grid=(num_parallel, steps),
            in_specs=[
                pl.BlockSpec((NCH, block_rows, LANE),
                             lambda p, s, plane_r, cam_r: (0, p * steps + s, 0)),
            ],
            out_specs=pl.BlockSpec((1, SUBLANE, LANE),
                                   lambda p, s, plane_r, cam_r: (p, 0, 0)),
        ),
        compiler_params=pltpu.CompilerParams(
            dimension_semantics=("parallel", "arbitrary")),
    )(plane, cam_table_flat, data_packed)

    # distance_function = MSE: mean over the N valid points of squared plane distance
    return jnp.sum(partials) / jnp.float32(n_valid)


# ----------------------------- plain-JAX glue --------------------------------
def unproject_ref(depths, points, camera_idxs, f, cx, cy, R, t):
    """Pinhole unprojection reference (used for plane init and correctness check)."""
    fi = f[camera_idxs]
    cxi = cx[camera_idxs]
    cyi = cy[camera_idxs]
    x = (points[:, 0] - cxi) / fi * depths
    y = (points[:, 1] - cyi) / fi * depths
    local = jnp.stack([x, y, depths], axis=-1)                       # (N, 3)
    world = jnp.einsum("nij,nj->ni", R[camera_idxs], local) + t[camera_idxs]
    return world


def fit_plane(pcd):
    """JAX port of the torch fit_plane (SVD of centered covariance)."""
    # TODO(synk): SVD has no Pallas equivalent; plane init runs once in plain JAX.
    mean = jnp.mean(pcd, axis=0)
    pcd_c = pcd - mean
    x = pcd_c.T @ pcd_c
    _, _, vh = jnp.linalg.svd(x)
    abc = vh[-1, :]                  # == torch.svd(x).v[:, -1]
    d = -jnp.dot(abc, mean)
    return jnp.concatenate([abc, d[None]]).astype(jnp.float32)


def floor_term_ref(plane, pcd):
    dist = pcd @ plane[:3] + plane[3]
    zeros = jnp.zeros_like(dist)
    return jnp.mean((dist - zeros) ** 2)


# --------------------------------- main --------------------------------------
if __name__ == "__main__":
    key = jax.random.PRNGKey(0)
    k1, k2, k3, k4, k5, k6 = jax.random.split(key, 6)

    N = 2000          # number of floor pixels (not a multiple of 1024 -> exercises padded tail)
    C = 4             # number of cameras
    IMG = 64.0

    depths = jax.random.uniform(k1, (N,), jnp.float32, 1.0, 3.0)
    points = jax.random.uniform(k2, (N, 2), jnp.float32, 0.0, IMG)   # pixel (u, v)
    camera_idxs = jax.random.randint(k3, (N,), 0, C)

    # deterministic per-camera pinhole intrinsics + z-axis-rotation extrinsics
    f = 50.0 + jax.random.uniform(k4, (C,), jnp.float32, -2.0, 2.0)
    cx = jnp.full((C,), IMG / 2, jnp.float32)
    cy = jnp.full((C,), IMG / 2, jnp.float32)
    theta = jax.random.uniform(k5, (C,), jnp.float32, -0.2, 0.2)
    ct, st = jnp.cos(theta), jnp.sin(theta)
    zeros_c, ones_c = jnp.zeros_like(ct), jnp.ones_like(ct)
    R = jnp.stack(
        [jnp.stack([ct, -st, zeros_c], -1),
         jnp.stack([st, ct, zeros_c], -1),
         jnp.stack([zeros_c, zeros_c, ones_c], -1)], axis=1)          # (C, 3, 3)
    t = 0.1 * jax.random.normal(k6, (C, 3), jnp.float32)

    # --- init (torch no_grad path): unproject floor and fit the plane ---
    floor_pcd_init = unproject_ref(depths, points, camera_idxs, f, cx, cy, R, t)
    plane = fit_plane(floor_pcd_init)

    # --- forward pass via Pallas kernel ---
    block_rows, steps, num_parallel, total_rows = plan_layout(N)
    data_packed = pack_point_data(depths, points, camera_idxs, total_rows)
    cam_table = pack_camera_table(f, cx, cy, R, t)
    floor_term = jax.block_until_ready(
        floor_term_pallas(plane, cam_table, data_packed, n_valid=N,
                          block_rows=block_rows, steps=steps,
                          num_parallel=num_parallel))

    # --- correctness check against pure-JAX reference ---
    ref = floor_term_ref(plane, floor_pcd_init)
    np.testing.assert_allclose(np.asarray(floor_term), np.asarray(ref),
                               rtol=2e-3, atol=1e-5)

    print("KERNEL_OK")
</pallas_src>

<mosaic_0001>
module attributes {stable_mosaic.version = 11 : i64} {
  func.func @floor_term_kernel(%arg0: i32, %arg1: i32, %arg2: memref<4xf32, #tpu.memory_space<smem>>, %arg3: memref<60xf32, #tpu.memory_space<smem>>, %arg4: memref<4x8x128xf32, #tpu.memory_space<vmem>>, %arg5: memref<1x8x128xf32, #tpu.memory_space<vmem>>) attributes {dimension_semantics = [#tpu.dimension_semantics<parallel>, #tpu.dimension_semantics<arbitrary>], iteration_bounds = array<i64: 2, 1>, scalar_prefetch = 2 : i64, scratch_operands = 0 : i64, tpu.core_type = #tpu.core_type<tc>, window_params = [{transform_indices = @transform_0, window_bounds = array<i64: 4, 8, 128>}, {transform_indices = @transform_1, window_bounds = array<i64: 1, 8, 128>}]} {
    %c0_i32 = arith.constant 0 : i32
    %0 = arith.cmpi eq, %arg1, %c0_i32 : i32
    %1 = arith.extui %0 : i1 to i32
    %c0_i32_0 = arith.constant 0 : i32
    %2 = arith.cmpi ne, %1, %c0_i32_0 : i32
    scf.if %2 {
      %cst_27 = arith.constant 0.000000e+00 : f32
      %243 = vector.broadcast %cst_27 : f32 to vector<1x8x128xf32>
      %c0_28 = arith.constant 0 : index
      %c0_29 = arith.constant 0 : index
      %c0_30 = arith.constant 0 : index
      %244 = vector.load %arg5[%c0_28, %c0_29, %c0_30] : memref<1x8x128xf32, #tpu.memory_space<vmem>>, vector<1x8x128xf32>
      tpu.vector_store %arg5[%c0_28, %c0_29, %c0_30], %243 {strides = array<i32>} : memref<1x8x128xf32, #tpu.memory_space<vmem>>, vector<1x8x128xf32>,
    } else {
    }
    %c0 = arith.constant 0 : index
    %c0_1 = arith.constant 0 : index
    %c0_2 = arith.constant 0 : index
    %3 = vector.load %arg4[%c0, %c0_1, %c0_2] : memref<4x8x128xf32, #tpu.memory_space<vmem>>, vector<1x8x128xf32>
    %4 = vector.shape_cast %3 : vector<1x8x128xf32> to vector<8x128xf32>
    %c1 = arith.constant 1 : index
    %c0_3 = arith.constant 0 : index
    %c0_4 = arith.constant 0 : index
    %5 = vector.load %arg4[%c1, %c0_3, %c0_4] : memref<4x8x128xf32, #tpu.memory_space<vmem>>, vector<1x8x128xf32>
    %6 = vector.shape_cast %5 : vector<1x8x128xf32> to vector<8x128xf32>
    %c2 = arith.constant 2 : index
    %c0_5 = arith.constant 0 : index
    %c0_6 = arith.constant 0 : index
    %7 = vector.load %arg4[%c2, %c0_5, %c0_6] : memref<4x8x128xf32, #tpu.memory_space<vmem>>, vector<1x8x128xf32>
    %8 = vector.shape_cast %7 : vector<1x8x128xf32> to vector<8x128xf32>
    %c3 = arith.constant 3 : index
    %c0_7 = arith.constant 0 : index
    %c0_8 = arith.constant 0 : index
    %9 = vector.load %arg4[%c3, %c0_7, %c0_8] : memref<4x8x128xf32, #tpu.memory_space<vmem>>, vector<1x8x128xf32>
    %10 = vector.shape_cast %9 : vector<1x8x128xf32> to vector<8x128xf32>
    %c0_9 = arith.constant 0 : index
    %11 = memref.load %arg2[%c0_9] : memref<4xf32, #tpu.memory_space<smem>>
    %c1_10 = arith.constant 1 : index
    %12 = memref.load %arg2[%c1_10] : memref<4xf32, #tpu.memory_space<smem>>
    %c2_11 = arith.constant 2 : index
    %13 = memref.load %arg2[%c2_11] : memref<4xf32, #tpu.memory_space<smem>>
    %c3_12 = arith.constant 3 : index
    %14 = memref.load %arg2[%c3_12] : memref<4xf32, #tpu.memory_space<smem>>
    %cst = arith.constant 0.000000e+00 : f32
    %15 = vector.broadcast %cst : f32 to vector<8x128xf32>
    %c0_13 = arith.constant 0 : index
    %16 = memref.load %arg3[%c0_13] : memref<60xf32, #tpu.memory_space<smem>>
    %c1_14 = arith.constant 1 : index
    %17 = memref.load %arg3[%c1_14] : memref<60xf32, #tpu.memory_space<smem>>
    %c2_15 = arith.constant 2 : index
    %18 = memref.load %arg3[%c2_15] : memref<60xf32, #tpu.memory_space<smem>>
    %c3_16 = arith.constant 3 : index
    %19 = memref.load %arg3[%c3_16] : memref<60xf32, #tpu.memory_space<smem>>
    %c4 = arith.constant 4 : index
    %20 = memref.load %arg3[%c4] : memref<60xf32, #tpu.memory_space<smem>>
    %c5 = arith.constant 5 : index
    %21 = memref.load %arg3[%c5] : memref<60xf32, #tpu.memory_space<smem>>
    %c6 = arith.constant 6 : index
    %22 = memref.load %arg3[%c6] : memref<60xf32, #tpu.memory_space<smem>>
    %c7 = arith.constant 7 : index
    %23 = memref.load %arg3[%c7] : memref<60xf32, #tpu.memory_space<smem>>
    %c8 = arith.constant 8 : index
    %24 = memref.load %arg3[%c8] : memref<60xf32, #tpu.memory_space<smem>>
    %c9 = arith.constant 9 : index
    %25 = memref.load %arg3[%c9] : memref<60xf32, #tpu.memory_space<smem>>
    %c10 = arith.constant 10 : index
    %26 = memref.load %arg3[%c10] : memref<60xf32, #tpu.memory_space<smem>>
    %c11 = arith.constant 11 : index
    %27 = memref.load %arg3[%c11] : memref<60xf32, #tpu.memory_space<smem>>
    %c12 = arith.constant 12 : index
    %28 = memref.load %arg3[%c12] : memref<60xf32, #tpu.memory_space<smem>>
    %c13 = arith.constant 13 : index
    %29 = memref.load %arg3[%c13] : memref<60xf32, #tpu.memory_space<smem>>
    %c14 = arith.constant 14 : index
    %30 = memref.load %arg3[%c14] : memref<60xf32, #tpu.memory_space<smem>>
    %31 = arith.mulf %11, %19 : f32
    %32 = arith.mulf %12, %22 : f32
    %33 = arith.addf %31, %32 : f32
    %34 = arith.mulf %13, %25 : f32
    %35 = arith.addf %33, %34 : f32
    %36 = arith.mulf %35, %16 : f32
    %37 = arith.mulf %11, %20 : f32
    %38 = arith.mulf %12, %23 : f32
    %39 = arith.addf %37, %38 : f32
    %40 = arith.mulf %13, %26 : f32
    %41 = arith.addf %39, %40 : f32
    %42 = arith.mulf %41, %16 : f32
    %43 = arith.mulf %11, %21 : f32
    %44 = arith.mulf %12, %24 : f32
    %45 = arith.addf %43, %44 : f32
    %46 = arith.mulf %13, %27 : f32
    %47 = arith.addf %45, %46 : f32
    %48 = arith.mulf %36, %17 : f32
    %49 = arith.subf %47, %48 : f32
    %50 = arith.mulf %42, %18 : f32
    %51 = arith.subf %49, %50 : f32
    %52 = arith.mulf %11, %28 : f32
    %53 = arith.mulf %12, %29 : f32
    %54 = arith.addf %52, %53 : f32
    %55 = arith.mulf %13, %30 : f32
    %56 = arith.addf %54, %55 : f32
    %57 = arith.addf %56, %14 : f32
    %58 = vector.broadcast %36 : f32 to vector<8x128xf32>
    %59 = arith.mulf %58, %6 : vector<8x128xf32>
    %60 = vector.broadcast %42 : f32 to vector<8x128xf32>
    %61 = arith.mulf %60, %8 : vector<8x128xf32>
    %62 = arith.addf %59, %61 : vector<8x128xf32>
    %63 = vector.broadcast %51 : f32 to vector<8x128xf32>
    %64 = arith.addf %62, %63 : vector<8x128xf32>
    %65 = arith.mulf %4, %64 : vector<8x128xf32>
    %66 = vector.broadcast %57 : f32 to vector<8x128xf32>
    %67 = arith.addf %65, %66 : vector<8x128xf32>
    %cst_17 = arith.constant 0.000000e+00 : f32
    %68 = vector.broadcast %cst_17 : f32 to vector<8x128xf32>
    %69 = arith.cmpf oeq, %10, %68 : vector<8x128xf32>
    %70 = arith.select %69, %67, %15 : vector<8x128xi1>, vector<8x128xf32>
    %c15 = arith.constant 15 : index
    %71 = memref.load %arg3[%c15] : memref<60xf32, #tpu.memory_space<smem>>
    %c16 = arith.constant 16 : index
    %72 = memref.load %arg3[%c16] : memref<60xf32, #tpu.memory_space<smem>>
    %c17 = arith.constant 17 : index
    %73 = memref.load %arg3[%c17] : memref<60xf32, #tpu.memory_space<smem>>
    %c18 = arith.constant 18 : index
    %74 = memref.load %arg3[%c18] : memref<60xf32, #tpu.memory_space<smem>>
    %c19 = arith.constant 19 : index
    %75 = memref.load %arg3[%c19] : memref<60xf32, #tpu.memory_space<smem>>
    %c20 = arith.constant 20 : index
    %76 = memref.load %arg3[%c20] : memref<60xf32, #tpu.memory_space<smem>>
    %c21 = arith.constant 21 : index
    %77 = memref.load %arg3[%c21] : memref<60xf32, #tpu.memory_space<smem>>
    %c22 = arith.constant 22 : index
    %78 = memref.load %arg3[%c22] : memref<60xf32, #tpu.memory_space<smem>>
    %c23 = arith.constant 23 : index
    %79 = memref.load %arg3[%c23] : memref<60xf32, #tpu.memory_space<smem>>
    %c24 = arith.constant 24 : index
    %80 = memref.load %arg3[%c24] : memref<60xf32, #tpu.memory_space<smem>>
    %c25 = arith.constant 25 : index
    %81 = memref.load %arg3[%c25] : memref<60xf32, #tpu.memory_space<smem>>
    %c26 = arith.constant 26 : index
    %82 = memref.load %arg3[%c26] : memref<60xf32, #tpu.memory_space<smem>>
    %c27 = arith.constant 27 : index
    %83 = memref.load %arg3[%c27] : memref<60xf32, #tpu.memory_space<smem>>
    %c28 = arith.constant 28 : index
    %84 = memref.load %arg3[%c28] : memref<60xf32, #tpu.memory_space<smem>>
    %c29 = arith.constant 29 : index
    %85 = memref.load %arg3[%c29] : memref<60xf32, #tpu.memory_space<smem>>
    %86 = arith.mulf %11, %74 : f32
    %87 = arith.mulf %12, %77 : f32
    %88 = arith.addf %86, %87 : f32
    %89 = arith.mulf %13, %80 : f32
    %90 = arith.addf %88, %89 : f32
    %91 = arith.mulf %90, %71 : f32
    %92 = arith.mulf %11, %75 : f32
    %93 = arith.mulf %12, %78 : f32
    %94 = arith.addf %92, %93 : f32
    %95 = arith.mulf %13, %81 : f32
    %96 = arith.addf %94, %95 : f32
    %97 = arith.mulf %96, %71 : f32
    %98 = arith.mulf %11, %76 : f32
    %99 = arith.mulf %12, %79 : f32
    %100 = arith.addf %98, %99 : f32
    %101 = arith.mulf %13, %82 : f32
    %102 = arith.addf %100, %101 : f32
    %103 = arith.mulf %91, %72 : f32
    %104 = arith.subf %102, %103 : f32
    %105 = arith.mulf %97, %73 : f32
    %106 = arith.subf %104, %105 : f32
    %107 = arith.mulf %11, %83 : f32
    %108 = arith.mulf %12, %84 : f32
    %109 = arith.addf %107, %108 : f32
    %110 = arith.mulf %13, %85 : f32
    %111 = arith.addf %109, %110 : f32
    %112 = arith.addf %111, %14 : f32
    %113 = vector.broadcast %91 : f32 to vector<8x128xf32>
    %114 = arith.mulf %113, %6 : vector<8x128xf32>
    %115 = vector.broadcast %97 : f32 to vector<8x128xf32>
    %116 = arith.mulf %115, %8 : vector<8x128xf32>
    %117 = arith.addf %114, %116 : vector<8x128xf32>
    %118 = vector.broadcast %106 : f32 to vector<8x128xf32>
    %119 = arith.addf %117, %118 : vector<8x128xf32>
    %120 = arith.mulf %4, %119 : vector<8x128xf32>
    %121 = vector.broadcast %112 : f32 to vector<8x128xf32>
    %122 = arith.addf %120, %121 : vector<8x128xf32>
    %cst_18 = arith.constant 1.000000e+00 : f32
    %123 = vector.broadcast %cst_18 : f32 to vector<8x128xf32>
    %124 = arith.cmpf oeq, %10, %123 : vector<8x128xf32>
    %125 = arith.select %124, %122, %70 : vector<8x128xi1>, vector<8x128xf32>
    %c30 = arith.constant 30 : index
    %126 = memref.load %arg3[%c30] : memref<60xf32, #tpu.memory_space<smem>>
    %c31 = arith.constant 31 : index
    %127 = memref.load %arg3[%c31] : memref<60xf32, #tpu.memory_space<smem>>
    %c32 = arith.constant 32 : index
    %128 = memref.load %arg3[%c32] : memref<60xf32, #tpu.memory_space<smem>>
    %c33 = arith.constant 33 : index
    %129 = memref.load %arg3[%c33] : memref<60xf32, #tpu.memory_space<smem>>
    %c34 = arith.constant 34 : index
    %130 = memref.load %arg3[%c34] : memref<60xf32, #tpu.memory_space<smem>>
    %c35 = arith.constant 35 : index
    %131 = memref.load %arg3[%c35] : memref<60xf32, #tpu.memory_space<smem>>
    %c36 = arith.constant 36 : index
    %132 = memref.load %arg3[%c36] : memref<60xf32, #tpu.memory_space<smem>>
    %c37 = arith.constant 37 : index
    %133 = memref.load %arg3[%c37] : memref<60xf32, #tpu.memory_space<smem>>
    %c38 = arith.constant 38 : index
    %134 = memref.load %arg3[%c38] : memref<60xf32, #tpu.memory_space<smem>>
    %c39 = arith.constant 39 : index
    %135 = memref.load %arg3[%c39] : memref<60xf32, #tpu.memory_space<smem>>
    %c40 = arith.constant 40 : index
    %136 = memref.load %arg3[%c40] : memref<60xf32, #tpu.memory_space<smem>>
    %c41 = arith.constant 41 : index
    %137 = memref.load %arg3[%c41] : memref<60xf32, #tpu.memory_space<smem>>
    %c42 = arith.constant 42 : index
    %138 = memref.load %arg3[%c42] : memref<60xf32, #tpu.memory_space<smem>>
    %c43 = arith.constant 43 : index
    %139 = memref.load %arg3[%c43] : memref<60xf32, #tpu.memory_space<smem>>
    %c44 = arith.constant 44 : index
    %140 = memref.load %arg3[%c44] : memref<60xf32, #tpu.memory_space<smem>>
    %141 = arith.mulf %11, %129 : f32
    %142 = arith.mulf %12, %132 : f32
    %143 = arith.addf %141, %142 : f32
    %144 = arith.mulf %13, %135 : f32
    %145 = arith.addf %143, %144 : f32
    %146 = arith.mulf %145, %126 : f32
    %147 = arith.mulf %11, %130 : f32
    %148 = arith.mulf %12, %133 : f32
    %149 = arith.addf %147, %148 : f32
    %150 = arith.mulf %13, %136 : f32
    %151 = arith.addf %149, %150 : f32
    %152 = arith.mulf %151, %126 : f32
    %153 = arith.mulf %11, %131 : f32
    %154 = arith.mulf %12, %134 : f32
    %155 = arith.addf %153, %154 : f32
    %156 = arith.mulf %13, %137 : f32
    %157 = arith.addf %155, %156 : f32
    %158 = arith.mulf %146, %127 : f32
    %159 = arith.subf %157, %158 : f32
    %160 = arith.mulf %152, %128 : f32
    %161 = arith.subf %159, %160 : f32
    %162 = arith.mulf %11, %138 : f32
    %163 = arith.mulf %12, %139 : f32
    %164 = arith.addf %162, %163 : f32
    %165 = arith.mulf %13, %140 : f32
    %166 = arith.addf %164, %165 : f32
    %167 = arith.addf %166, %14 : f32
    %168 = vector.broadcast %146 : f32 to vector<8x128xf32>
    %169 = arith.mulf %168, %6 : vector<8x128xf32>
    %170 = vector.broadcast %152 : f32 to vector<8x128xf32>
    %171 = arith.mulf %170, %8 : vector<8x128xf32>
    %172 = arith.addf %169, %171 : vector<8x128xf32>
    %173 = vector.broadcast %161 : f32 to vector<8x128xf32>
    %174 = arith.addf %172, %173 : vector<8x128xf32>
    %175 = arith.mulf %4, %174 : vector<8x128xf32>
    %176 = vector.broadcast %167 : f32 to vector<8x128xf32>
    %177 = arith.addf %175, %176 : vector<8x128xf32>
    %cst_19 = arith.constant 2.000000e+00 : f32
    %178 = vector.broadcast %cst_19 : f32 to vector<8x128xf32>
    %179 = arith.cmpf oeq, %10, %178 : vector<8x128xf32>
    %180 = arith.select %179, %177, %125 : vector<8x128xi1>, vector<8x128xf32>
    %c45 = arith.constant 45 : index
    %181 = memref.load %arg3[%c45] : memref<60xf32, #tpu.memory_space<smem>>
    %c46 = arith.constant 46 : index
    %182 = memref.load %arg3[%c46] : memref<60xf32, #tpu.memory_space<smem>>
    %c47 = arith.constant 47 : index
    %183 = memref.load %arg3[%c47] : memref<60xf32, #tpu.memory_space<smem>>
    %c48 = arith.constant 48 : index
    %184 = memref.load %arg3[%c48] : memref<60xf32, #tpu.memory_space<smem>>
    %c49 = arith.constant 49 : index
    %185 = memref.load %arg3[%c49] : memref<60xf32, #tpu.memory_space<smem>>
    %c50 = arith.constant 50 : index
    %186 = memref.load %arg3[%c50] : memref<60xf32, #tpu.memory_space<smem>>
    %c51 = arith.constant 51 : index
    %187 = memref.load %arg3[%c51] : memref<60xf32, #tpu.memory_space<smem>>
    %c52 = arith.constant 52 : index
    %188 = memref.load %arg3[%c52] : memref<60xf32, #tpu.memory_space<smem>>
    %c53 = arith.constant 53 : index
    %189 = memref.load %arg3[%c53] : memref<60xf32, #tpu.memory_space<smem>>
    %c54 = arith.constant 54 : index
    %190 = memref.load %arg3[%c54] : memref<60xf32, #tpu.memory_space<smem>>
    %c55 = arith.constant 55 : index
    %191 = memref.load %arg3[%c55] : memref<60xf32, #tpu.memory_space<smem>>
    %c56 = arith.constant 56 : index
    %192 = memref.load %arg3[%c56] : memref<60xf32, #tpu.memory_space<smem>>
    %c57 = arith.constant 57 : index
    %193 = memref.load %arg3[%c57] : memref<60xf32, #tpu.memory_space<smem>>
    %c58 = arith.constant 58 : index
    %194 = memref.load %arg3[%c58] : memref<60xf32, #tpu.memory_space<smem>>
    %c59 = arith.constant 59 : index
    %195 = memref.load %arg3[%c59] : memref<60xf32, #tpu.memory_space<smem>>
    %196 = arith.mulf %11, %184 : f32
    %197 = arith.mulf %12, %187 : f32
    %198 = arith.addf %196, %197 : f32
    %199 = arith.mulf %13, %190 : f32
    %200 = arith.addf %198, %199 : f32
    %201 = arith.mulf %200, %181 : f32
    %202 = arith.mulf %11, %185 : f32
    %203 = arith.mulf %12, %188 : f32
    %204 = arith.addf %202, %203 : f32
    %205 = arith.mulf %13, %191 : f32
    %206 = arith.addf %204, %205 : f32
    %207 = arith.mulf %206, %181 : f32
    %208 = arith.mulf %11, %186 : f32
    %209 = arith.mulf %12, %189 : f32
    %210 = arith.addf %208, %209 : f32
    %211 = arith.mulf %13, %192 : f32
    %212 = arith.addf %210, %211 : f32
    %213 = arith.mulf %201, %182 : f32
    %214 = arith.subf %212, %213 : f32
    %215 = arith.mulf %207, %183 : f32
    %216 = arith.subf %214, %215 : f32
    %217 = arith.mulf %11, %193 : f32
    %218 = arith.mulf %12, %194 : f32
    %219 = arith.addf %217, %218 : f32
    %220 = arith.mulf %13, %195 : f32
    %221 = arith.addf %219, %220 : f32
    %222 = arith.addf %221, %14 : f32
    %223 = vector.broadcast %201 : f32 to vector<8x128xf32>
    %224 = arith.mulf %223, %6 : vector<8x128xf32>
    %225 = vector.broadcast %207 : f32 to vector<8x128xf32>
    %226 = arith.mulf %225, %8 : vector<8x128xf32>
    %227 = arith.addf %224, %226 : vector<8x128xf32>
    %228 = vector.broadcast %216 : f32 to vector<8x128xf32>
    %229 = arith.addf %227, %228 : vector<8x128xf32>
    %230 = arith.mulf %4, %229 : vector<8x128xf32>
    %231 = vector.broadcast %222 : f32 to vector<8x128xf32>
    %232 = arith.addf %230, %231 : vector<8x128xf32>
    %cst_20 = arith.constant 3.000000e+00 : f32
    %233 = vector.broadcast %cst_20 : f32 to vector<8x128xf32>
    %234 = arith.cmpf oeq, %10, %233 : vector<8x128xf32>
    %235 = arith.select %234, %232, %180 : vector<8x128xi1>, vector<8x128xf32>
    %236 = arith.mulf %235, %235 : vector<8x128xf32>
    %c0_21 = arith.constant 0 : index
    %c0_22 = arith.constant 0 : index
    %c0_23 = arith.constant 0 : index
    %237 = vector.load %arg5[%c0_21, %c0_22, %c0_23] : memref<1x8x128xf32, #tpu.memory_space<vmem>>, vector<1x8x128xf32>
    %238 = vector.shape_cast %237 : vector<1x8x128xf32> to vector<8x128xf32>
    %239 = arith.addf %238, %236 : vector<8x128xf32>
    %c0_24 = arith.constant 0 : index
    %c0_25 = arith.constant 0 : index
    %c0_26 = arith.constant 0 : index
    %240 = vector.load %arg5[%c0_24, %c0_25, %c0_26] : memref<1x8x128xf32, #tpu.memory_space<vmem>>, vector<1x8x128xf32>
    %241 = vector.shape_cast %240 : vector<1x8x128xf32> to vector<8x128xf32>
    %242 = vector.shape_cast %239 : vector<8x128xf32> to vector<1x8x128xf32>
    tpu.vector_store %arg5[%c0_24, %c0_25, %c0_26], %242 {strides = array<i32>} : memref<1x8x128xf32, #tpu.memory_space<vmem>>, vector<1x8x128xf32>,
    return
  }
  func.func @transform_0(%arg0: i32, %arg1: i32, %arg2: memref<4xf32, #tpu.memory_space<smem>>, %arg3: memref<60xf32, #tpu.memory_space<smem>>) -> (i32, i32, i32) {
    %c1_i32 = arith.constant 1 : i32
    %0 = arith.muli %arg0, %c1_i32 : i32
    %1 = arith.addi %0, %arg1 : i32
    %c0_i32 = arith.constant 0 : i32
    %c0_i32_0 = arith.constant 0 : i32
    %c0_i32_1 = arith.constant 0 : i32
    return %c0_i32, %1, %c0_i32_0 : i32, i32, i32
  }
  func.func @transform_1(%arg0: i32, %arg1: i32, %arg2: memref<4xf32, #tpu.memory_space<smem>>, %arg3: memref<60xf32, #tpu.memory_space<smem>>) -> (i32, i32, i32) {
    %c0_i32 = arith.constant 0 : i32
    %c0_i32_0 = arith.constant 0 : i32
    %c0_i32_1 = arith.constant 0 : i32
    return %arg0, %c0_i32, %c0_i32_0 : i32, i32, i32
  }
}

</mosaic_0001>

<bundles_post_ra>
// kernel: tpu_custom_call.1
= control target key start
LH: loop header
LB: loop body
LE: loop exit
PB: predicated region body
PF: predicated region fallthrough
CT: control target
= control target key end

     0   :  { %s767_s12 = smov [#allocation3]   ;;  %s1130_s0 = inlined_call_operand.hbm [shape: f32[4], index: 0, kind: input, shape index: {}]   ;;  %s1131_s2 = inlined_call_operand.hbm [shape: f32[4,16,128], index: 2, kind: input, shape index: {}]   ;;  %s1132_s3 = inlined_call_operand.hbm [shape: f32[2,8,128], index: 3, kind: output, shape index: {}]   ;;  %s1133_s1 = inlined_call_operand.vmem [shape: f32[60], index: 1, kind: input, shape index: {}]  }
   0x1   :  { %1154 = sst [smem:[#allocation32_spill]] %s1131_s2  ;;  %s10_s17 = sshll.u32 %s1133_s1, 4  ;;  %s11_s17 = int_to_ptr.vmem [resolvable:$true] %s10_s17 }
   0x2   :  { %1155 = sst [smem:[#allocation33_spill]] %s1132_s3  ;;  %s643_s18 = scalar_lea.vmem %s11_s17, 16 }
   0x3   :  { %9 = dma.hbm_to_smem %s1130_s0, 16, %s767_s12, [#allocation2] }
   0x4   :  { %p644_p0 = scmp.ne.s32.totalorder %s11_s17, %s643_s18  ;;  %p648_p1 = scmp.lt.s32.totalorder %s11_s17, %s11_s17 }
   0x5   :  { %p649_p2 = scmp.lt.s32.totalorder %s643_s18, %s643_s18 }
   0x7   :  { %p650_p3 = por %p649_p2, %p648_p1 }
   0x9   :  { %p651_p4 = pnand %p650_p3, %p644_p0 }
   0xb   :  { %654 = shalt.err (!%p651_p4)  }
   0xc   :  { %s768_s19 = smov [#allocation4]  }
   0xd   :  { %13 = dma.vmem_to_smem %s11_s17, 16, %s768_s19, [#allocation2] }
   0xe   :  { %733 = dma.done.wait [#allocation2], 32 }
   0xf   :  { %734 = vsyncadd [#allocation2], 4294967264 }
  0x10   :  { %15 = sfence }
  0x11   :  { %16 = vsyncpa [#allocation6], 0 }
  0x12   :  { %18 = vsyncpa [#allocation6 + $0x1], 0 }
  0x13   :  { %19 = vsyncpa [#allocation7], 0 }
  0x14   :  { %21 = vsyncpa [#allocation7 + $0x1], 0  ;;  %s800_s0 = smov 0   ;;  %s802_s1 = smov 0  }
  0x15   :  { %s804_s20 = smov 0   ;;  %s806_s21 = smov 0  }
  0x16   :  { %s808_s22 = smov 0   ;;  %s810_s23 = smov 0  }
  0x17 LB: > { %1156 = sst [smem:[#allocation12_spill]] %s745_s0  ;;  %s489_s24 = sadd.s32 4294967295, %s765_s23   ;;  %s765_s23 = sphi %s810_s23, %s27_s23   ;;  %s761_s22 = sphi %s808_s22, %s1209_s22   ;;  %s757_s21 = sphi %s806_s21, %s1208_s21   ;;  %s753_s20 = sphi %s804_s20, %s1207_s20   ;;  %s749_s1 = sphi %s802_s1, %s1206_s1   ;;  %s745_s0 = sphi %s800_s0, %s1205_s0  }
  0x18   : > { %1157 = sst [smem:[#allocation13_spill]] %s749_s1  ;;  %s490_s25 = sadd.s32 4294967294, %s765_s23  }
  0x19   : > { %1158 = sst [smem:[#allocation14_spill]] %s753_s20  ;;  %s39_s26 = sadd.s32 1, %s761_s22 }
  0x1a   : > { %1159 = sst [smem:[#allocation15_spill]] %s757_s21  ;;  %s48_s27 = sadd.s32 1, %s753_s20 }
  0x1b   : > { %1160 = sst [smem:[#allocation16_spill]] %s761_s22  ;;  %p41_p5 = scmp.ge.s32.totalorder %s39_s26, 2 }
  0x1c   : > { %1161 = sst [smem:[#allocation17_spill]] %s765_s23  ;;  %p55_p6 = scmp.ne.s32.totalorder %s753_s20, %s749_s1 }
  0x1d   : > { %p56_p7 = scmp.eq.s32.totalorder %s765_s23, 0  ;;  %p61_p8 = scmp.ne.s32.totalorder %s749_s1, %s745_s0 }
  0x1e   : > { %s1211_s26 = smov (%p41_p5, %s39_s26), 0  ;;  %p62_p10 = scmp.eq.s32.totalorder %s489_s24, 0 }
  0x1f   : > { %1162 = sst [smem:[#allocation18_spill]] %s1211_s26  ;;  %p841_p9 = por %p56_p7, %p55_p6 }
  0x20   : > { %s45_s29 = ssub.s32 %s761_s22, %s1211_s26  ;;  %p85_p11 = scmp.eq.s32.totalorder %s489_s24, 1 }
  0x21   : > { %p46_p12 = scmp.eq.s32.totalorder %s45_s29, 0  ;;  %p847_p13 = por %p62_p10, %p61_p8 }
  0x22   : > { %p851_p0 = por %p85_p11, %p55_p6  ;;  %p91_p1 = scmp.eq.s32.totalorder %s490_s25, 1 }
  0x23   : > { %s856_s5 = scalar_select %p46_p12, %s753_s20, %s48_s27  }
  0x24   : > { %s1165_s4 = scalar_select %p851_p0, 1, 0 }
  0x25   : > { %1167 = sst [smem:[#allocation20_spill]] %s856_s5  ;;  %p858_p2 = por %p91_p1, %p61_p8 }
  0x26   : > { %1166 = sst [smem:[#allocation19_spill]] %s1165_s4  ;;  %p579_p4 = scmp.lt.s32.totalorder %s765_s23, 2 }
  0x27   : > { %s1168_s6 = scalar_select %p858_p2, 1, 0 }
  0x28   : > { %s111_s7 = sand.u32 1, %s753_s20   ;;  %s494_s9 = sshll.u32 %s761_s22, 7 }
  0x29   : > { %1169 = sst [smem:[#allocation21_spill]] %s1168_s6  ;;  %s493_s8 = sshll.u32 %s111_s7, 5 }
  0x2a   : > { %s1170_s2 = sld [smem:[#allocation32_spill]]  ;;  %s115_s13 = scalar_lea.vmem [#allocation5], %s493_s8 }
  0x2b   : > { %s122_s14 = sshll.u32 %s115_s13, 4  ;;  %p871_p5 = pnand %p579_p4, %p841_p9  ;;  %s123_s14 = int_to_ptr.vmem [resolvable:$true] %s122_s14 }
  0x2c   : > { %s112_s16 = scalar_lea.sflag [#allocation6], %s111_s7  ;;  %s668_s17 = scalar_lea.vmem %s123_s14, 512 }
  0x2d   : > { %p657_p6 = pneg %p871_p5  ;;  %p669_p7 = scmp.ne.s32.totalorder %s123_s14, %s668_s17 }
  0x2e   : > { %s769_s18 = smov [#allocation5]  }
  0x2f   : > { %p671_p8 = pnand %p669_p7, %p657_p6  ;;  %s673_s19 = sshll.u32 %s769_s18, 4  ;;  %s674_s19 = int_to_ptr.vmem [resolvable:$false] %s673_s19 }
  0x30   : > { %s121_s12 = scalar_lea.hbm %s1170_s2, %s494_s9  ;;  %s675_s24 = scalar_lea.vmem %s674_s19, 1024 }
  0x31   : > { %p672_p10 = pneg %p671_p8  ;;  %p676_p11 = scmp.lt.s32.totalorder %s123_s14, %s674_s19 }
  0x32   : > { %p677_p12 = scmp.lt.s32.totalorder %s675_s24, %s668_s17 }
  0x34   : > { %p678_p1 = por %p677_p12, %p676_p11 }
  0x36   : > { %p679_p3 = pnand %p678_p1, %p672_p10 }
  0x38   : > { %682 = shalt.err (!%p679_p3)
}
  0x39   : > { %s770_s25 = smov 256   ;;  %s771_s27 = smov 128  }
  0x3a   : > { %s772_s28 = smov 8   ;;  %p495_p9 = scmp.ge.s32.totalorder %s765_s23, 1 }
  0x3b   : > { %574 = dma.hbm_to_vmem [thread:$0]  (!%p871_p5), %s121_s12, 512, %s123_s14, %s112_s16, %s770_s25, %s771_s27, %s772_s28  }
  0x3c   : > { %p130_p4 = scmp.lt.s32.totalorder %s765_s23, 3 }
  0x3e   : > { %p131_p6 = pnand %p495_p9, %p130_p4 }
  0x40   : > { %134 = sbr.rel (%p131_p6) target bundleno = 230 (0xe6), region = 24 }
  0x45   : > { %s882_s29 = sand.u32 1, %s749_s1  }
  0x46   : > { %1172 = sst [smem:[#allocation22_spill]] %s882_s29  ;;  %s496_s7 = sshll.u32 %s882_s29, 5 }
  0x47   : > { %s137_s8 = scalar_lea.sflag [#allocation6], %s882_s29  ;;  %s886_s9 = scalar_lea.vmem [#allocation5], %s496_s7 }
  0x48   : > { %1173 = sst [smem:[#allocation23_spill]] %s886_s9 }
  0x49   : > { %736 = dma.done.wait (%p847_p13), %s137_s8, 512  }
  0x4a   : > { %738 = vsyncadd (%p847_p13), %s137_s8, 4294966784  ;;  %s892_s10 = sld [smem:[#allocation3]] }
  0x4b   : > { %s894_s11 = sld [smem:[#allocation3 + $0x1]] }
  0x4c   : > { %s896_s12 = sld [smem:[#allocation3 + $0x2]] }
  0x4d   : > { %s898_s13 = sld [smem:[#allocation4]] }
  0x4e   : > { %s900_s14 = sld [smem:[#allocation4 + $0x1]] }
  0x4f   : > { %s902_s15 = sld [smem:[#allocation4 + $0x2]] }
  0x50   : > { %s506_s16 = sld [smem:[#allocation4 + $0x3]] }
  0x51   : > { %s507_s30 = sld [smem:[#allocation4 + $0x4]] }
  0x52   : > { %s508_s17 = sld [smem:[#allocation4 + $0x5]] }
  0x53   : > { %s509_s18 = sld [smem:[#allocation4 + $0x6]] }
  0x54   : > { %s510_s19 = sld [smem:[#allocation4 + $0x7]] }
  0x55   : > { %s511_s24 = sld [smem:[#allocation4 + $0x8]] }
  0x56   : > { %s512_s25 = sld [smem:[#allocation4 + $0x9]]  ;;  %s191_s27 = smul.f32 %s506_s16, %s892_s10 }
  0x57   : > { %s513_s28 = sld [smem:[#allocation4 + $0xa]]  ;;  %s197_s7 = smul.f32 %s507_s30, %s892_s10 }
  0x58   : > { %s514_s8 = sld [smem:[#allocation4 + $0xb]]  ;;  %s203_s2 = smul.f32 %s508_s17, %s892_s10 }
  0x59   : > { %s515_s26 = sld [smem:[#allocation4 + $0xc]]  ;;  %s192_s22 = smul.f32 %s509_s18, %s894_s11 }
  0x5a   : > { %s516_s5 = sld [smem:[#allocation4 + $0xd]]  ;;  %s198_s20 = smul.f32 %s510_s19, %s894_s11 }
  0x5b   : > { %s517_s1 = sld [smem:[#allocation4 + $0xe]]  ;;  %s204_s23 = smul.f32 %s511_s24, %s894_s11 }
  0x5c   : > { %s193_s6 = sadd.f32 %s192_s22, %s191_s27  ;;  %s194_s0 = smul.f32 %s512_s25, %s896_s12 }
  0x5d   : > { %s199_s3 = sadd.f32 %s198_s20, %s197_s7  ;;  %s200_s16 = smul.f32 %s513_s28, %s896_s12 }
  0x5e   : > { %s195_s4 = sadd.f32 %s194_s0, %s193_s6  ;;  %s206_s30 = smul.f32 %s514_s8, %s896_s12 }
  0x5f   : > { %s201_s21 = sadd.f32 %s200_s16, %s199_s3  ;;  %s212_s22 = smul.f32 %s515_s26, %s892_s10 }
  0x60   : > { %s914_s17 = smul.f32 %s195_s4, %s898_s13  ;;  %s205_s18 = sadd.f32 %s204_s23, %s203_s2 }
  0x61   : > { %s916_s29 = sld [smem:[#allocation3 + $0x3]]  ;;  %s919_s19 = smul.f32 %s201_s21, %s898_s13 }
  0x62   : > { %1174 = sst [smem:[#allocation24_spill]] %s914_s17  ;;  %s208_s9 = smul.f32 %s900_s14, %s914_s17 }
  0x63   : > { %1175 = sst [smem:[#allocation25_spill]] %s919_s19  ;;  %s213_s20 = smul.f32 %s516_s5, %s894_s11 }
  0x64   : > { %s207_s24 = sadd.f32 %s206_s30, %s205_s18  ;;  %s210_s3 = smul.f32 %s902_s15, %s919_s19 }
  0x65   : > { %s924_s25 = sld [smem:[#allocation4 + $0xf]]  ;;  %s215_s23 = smul.f32 %s517_s1, %s896_s12 }
  0x66   : > { %s927_s0 = sld [smem:[#allocation4 + $0x10]] }
  0x67   : > { %s209_s6 = ssub.f32 %s207_s24, %s208_s9 }
  0x68   : > { %s931_s4 = sld [smem:[#allocation4 + $0x11]] }
  0x69   : > { %s214_s2 = sadd.f32 %s213_s20, %s212_s22 }
  0x6a   : > { %s521_s21 = sld [smem:[#allocation4 + $0x12]] }
  0x6b   : > { %s934_s13 = ssub.f32 %s209_s6, %s210_s3 }
  0x6c   : > { %s522_s26 = sld [smem:[#allocation4 + $0x13]] }
  0x6d   : > { %1176 = sst [smem:[#allocation26_spill]] %s934_s13 }
  0x6e   : > { %s936_s14 = sadd.f32 %s215_s23, %s214_s2 }
  0x6f   : > { %s523_s5 = sld [smem:[#allocation4 + $0x14]] }
  0x70   : > { %1177 = sst [smem:[#allocation27_spill]] %s936_s14  ;;  %s245_s7 = smul.f32 %s521_s21, %s892_s10 }
  0x71   : > { %s524_s27 = sld [smem:[#allocation4 + $0x15]] }
  0x72   : > { %s525_s9 = sld [smem:[#allocation4 + $0x16]]  ;;  %s251_s1 = smul.f32 %s522_s26, %s892_s10 }
  0x73   : > { %s526_s28 = sld [smem:[#allocation4 + $0x17]] }
  0x74   : > { %s527_s15 = sld [smem:[#allocation4 + $0x18]] }
  0x75   : > { %s528_s8 = sld [smem:[#allocation4 + $0x19]]  ;;  %s257_s30 = smul.f32 %s523_s5, %s892_s10 }
  0x76   : > { %s529_s16 = sld [smem:[#allocation4 + $0x1a]] }
  0x77   : > { %s530_s18 = sld [smem:[#allocation4 + $0x1b]]  ;;  %s246_s24 = smul.f32 %s524_s27, %s894_s11 }
  0x78   : > { %s531_s22 = sld [smem:[#allocation4 + $0x1c]]  ;;  %s252_s20 = smul.f32 %s525_s9, %s894_s11 }
  0x79   : > { %s532_s6 = sld [smem:[#allocation4 + $0x1d]]  ;;  %s258_s3 = smul.f32 %s526_s28, %s894_s11 }
  0x7a   : > { %s247_s2 = sadd.f32 %s246_s24, %s245_s7  ;;  %s248_s23 = smul.f32 %s527_s15, %s896_s12 }
  0x7b   : > { %s253_s21 = sadd.f32 %s252_s20, %s251_s1  ;;  %s254_s26 = smul.f32 %s528_s8, %s896_s12 }
  0x7c   : > { %s249_s13 = sadd.f32 %s248_s23, %s247_s2  ;;  %s260_s19 = smul.f32 %s529_s16, %s896_s12 }
  0x7d   : > { %s255_s5 = sadd.f32 %s254_s26, %s253_s21  ;;  %s266_s15 = smul.f32 %s530_s18, %s892_s10 }
  0x7e   : > { %s948_s17 = smul.f32 %s924_s25, %s249_s13  ;;  %s259_s27 = sadd.f32 %s258_s3, %s257_s30 }
  0x7f   : > { %s953_s28 = smul.f32 %s924_s25, %s255_s5  ;;  %s958_s1 = sld [smem:[#allocation4 + $0x1e]] }
  0x80   : > { %1178 = sst [smem:[#allocation28_spill]] %s948_s17  ;;  %s262_s24 = smul.f32 %s927_s0, %s948_s17 }
  0x81   : > { %1179 = sst [smem:[#allocation29_spill]] %s953_s28  ;;  %s267_s20 = smul.f32 %s531_s22, %s894_s11 }
  0x82   : > { %s261_s7 = sadd.f32 %s260_s19, %s259_s27  ;;  %s264_s2 = smul.f32 %s931_s4, %s953_s28 }
  0x83   : > { %s961_s8 = sld [smem:[#allocation4 + $0x1f]]  ;;  %s269_s3 = smul.f32 %s532_s6, %s896_s12 }
  0x84   : > { %s263_s16 = ssub.f32 %s261_s7, %s262_s24 }
  0x85   : > { %s965_s13 = sld [smem:[#allocation4 + $0x20]] }
  0x86   : > { %s268_s30 = sadd.f32 %s267_s20, %s266_s15 }
  0x87   : > { %s536_s25 = sld [smem:[#allocation4 + $0x21]] }
  0x88   : > { %s968_s23 = ssub.f32 %s263_s16, %s264_s2 }
  0x89   : > { %s537_s19 = sld [smem:[#allocation4 + $0x22]] }
  0x8a   : > { %1180 = sst [smem:[#allocation30_spill]] %s968_s23 }
  0x8b   : > { %s970_s0 = sadd.f32 %s269_s3, %s268_s30 }
  0x8c   : > { %s538_s18 = sld [smem:[#allocation4 + $0x23]] }
  0x8d   : > { %1181 = sst [smem:[#allocation31_spill]] %s970_s0  ;;  %s299_s5 = smul.f32 %s536_s25, %s892_s10 }
  0x8e   : > { %s539_s22 = sld [smem:[#allocation4 + $0x24]] }
  0x8f   : > { %s540_s21 = sld [smem:[#allocation4 + $0x25]]  ;;  %s305_s6 = smul.f32 %s537_s19, %s892_s10 }
  0x90   : > { %s541_s26 = sld [smem:[#allocation4 + $0x26]] }
  0x91   : > { %s542_s4 = sld [smem:[#allocation4 + $0x27]] }
  0x92   : > { %s543_s27 = sld [smem:[#allocation4 + $0x28]]  ;;  %s311_s24 = smul.f32 %s538_s18, %s892_s10 }
  0x93   : > { %s544_s7 = sld [smem:[#allocation4 + $0x29]] }
  0x94   : > { %s545_s15 = sld [smem:[#allocation4 + $0x2a]]  ;;  %s300_s20 = smul.f32 %s539_s22, %s894_s11 }
  0x95   : > { %s546_s16 = sld [smem:[#allocation4 + $0x2b]]  ;;  %s306_s2 = smul.f32 %s540_s21, %s894_s11 }
  0x96   : > { %s977_s30 = sld [smem:[#allocation4 + $0x2c]]  ;;  %s312_s3 = smul.f32 %s541_s26, %s894_s11 }
  0x97   : > { %s301_s25 = sadd.f32 %s300_s20, %s299_s5  ;;  %s302_s9 = smul.f32 %s542_s4, %s896_s12 }
  0x98   : > { %s307_s14 = sadd.f32 %s306_s2, %s305_s6  ;;  %s308_s19 = smul.f32 %s543_s27, %s896_s12 }
  0x99   : > { %s303_s23 = sadd.f32 %s302_s9, %s301_s25  ;;  %s314_s18 = smul.f32 %s544_s7, %s896_s12 }
  0x9a   : > { %s309_s28 = sadd.f32 %s308_s19, %s307_s14  ;;  %s320_s27 = smul.f32 %s545_s15, %s892_s10 }
  0x9b   : > { %s984_s17 = smul.f32 %s958_s1, %s303_s23  ;;  %s313_s22 = sadd.f32 %s312_s3, %s311_s24 }
  0x9c   : > { %s1182_s21 = sld [smem:[#allocation23_spill]]  ;;  %s989_s5 = smul.f32 %s958_s1, %s309_s28 }
  0x9d   : > { %s1183_s20 = sld [smem:[#allocation24_spill]]  ;;  %s316_s2 = smul.f32 %s961_s8, %s984_s17  ;;  %v326_v10 = vstv %s984_s17 }
  0x9e   : > { %s315_s4 = sadd.f32 %s314_s18, %s313_s22  ;;  %s321_s7 = smul.f32 %s546_s16, %s894_s11  ;;  %v328_v11 = vstv %s989_s5 }
  0x9f   : > { %s1184_s6 = sld [smem:[#allocation25_spill]]  ;;  %s318_s19 = smul.f32 %s965_s13, %s989_s5 }
  0xa0   : > { %s994_s9 = sld [smem:[#allocation4 + $0x2d]]  ;;  %s323_s28 = smul.f32 %s977_s30, %s896_s12 }
  0xa1   : > { %s997_s25 = sld [smem:[#allocation4 + $0x2e]] }
  0xa2   : > { %s317_s14 = ssub.f32 %s315_s4, %s316_s2  ;;  %v1010_v0 = vld [vmem:[%s1182_s21 + $0x8] sm:$0xff]  ;;  %v1013_v1 = vld [vmem:[%s1182_s21 + $0x10] sm:$0xff]  ;;  %v165_v19 = vld [vmem:[%s1182_s21] sm:$0xff] }
  0xa3   : > { %s1185_s23 = sld [smem:[#allocation28_spill]]  ;;  %v218_v2 = vstv %s1183_s20  ;;  %v327_v14 = vmul.f32 %v1010_v0, %v326_v10  ;;  %v329_v15 = vmul.f32 %v1013_v1, %v328_v11  ;;  %v500_v25 = vld [vmem:[%s1182_s21 + $0x18] sm:$0xff] }
  0xa4   : > { %s1186_s24 = sld [smem:[#allocation29_spill]]  ;;  %v219_v4 = vmul.f32 %v1010_v0, %v218_v2  ;;  %vm228_vm0 = vcmp.eq.f32.partialorder %v500_v25, 0.0  ;;  %vm282_vm1 = vcmp.eq.f32.partialorder %v500_v25, 1.0  ;;  %vm336_vm2 = vcmp.eq.f32.partialorder %v500_v25, 2.0 }
  0xa5   : > { %s1001_s3 = sld [smem:[#allocation4 + $0x2f]]  ;;  %v220_v3 = vstv %s1184_s6  ;;  %v330_v20 = vadd.f32 %v329_v15, %v327_v14  ;;  %vm390_vm3 = vcmp.eq.f32.partialorder %v500_v25, 3.0 }
  0xa6   : > { %s322_s26 = sadd.f32 %s321_s7, %s320_s27  ;;  %v221_v5 = vmul.f32 %v1013_v1, %v220_v3 }
  0xa7   : > { %s1005_s1 = sld [smem:[#allocation4 + $0x30]] }
  0xa8   : > { %s1007_s0 = ssub.f32 %s317_s14, %s318_s19  ;;  %v222_v12 = vadd.f32 %v221_v5, %v219_v4 }
  0xa9   : > { %s1017_s8 = sld [smem:[#allocation4 + $0x31]]  ;;  %v272_v6 = vstv %s1185_s23 }
  0xaa   : > { %s1019_s13 = sadd.f32 %s323_s28, %s322_s26  ;;  %v274_v7 = vstv %s1186_s24  ;;  %v273_v8 = vmul.f32 %v1010_v0, %v272_v6  ;;  %v331_v22 = vstv %s1007_s0 }
  0xab   : > { %s1021_s15 = sld [smem:[#allocation4 + $0x32]]  ;;  %v275_v9 = vmul.f32 %v1013_v1, %v274_v7  ;;  %v332_v26 = vadd.f32 %v331_v22, %v330_v20 }
  0xac   : > { %s1187_s16 = sld [smem:[#allocation26_spill]] }
  0xad   : > { %s554_s30 = sld [smem:[#allocation4 + $0x33]]  ;;  %s353_s4 = smul.f32 %s1005_s1, %s892_s10  ;;  %v276_v16 = vadd.f32 %v275_v9, %v273_v8  ;;  %v333_v34 = vmul.f32 %v332_v26, %v165_v19 }
  0xae   : > { %s1027_s18 = sld [smem:[#allocation4 + $0x34]] }
  0xaf   : > { %s1029_s22 = sld [smem:[#allocation4 + $0x35]]  ;;  %s359_s2 = smul.f32 %s1017_s8, %s892_s10 }
  0xb0   : > { %s557_s26 = sld [smem:[#allocation4 + $0x36]] }
  0xb1   : > { %s1188_s20 = sld [smem:[#allocation30_spill]]  ;;  %s365_s7 = smul.f32 %s1021_s15, %s892_s10 }
  0xb2   : > { %s558_s6 = sld [smem:[#allocation4 + $0x37]]  ;;  %v223_v13 = vstv %s1187_s16 }
  0xb3   : > { %s1040_s27 = sld [smem:[#allocation4 + $0x38]]  ;;  %s354_s5 = smul.f32 %s554_s30, %s894_s11  ;;  %v224_v17 = vadd.f32 %v223_v13, %v222_v12 }
  0xb4   : > { %s1046_s17 = sld [smem:[#allocation4 + $0x39]]  ;;  %s360_s23 = smul.f32 %s1027_s18, %s894_s11 }
  0xb5   : > { %s1049_s14 = sld [smem:[#allocation4 + $0x3a]]  ;;  %s366_s28 = smul.f32 %s1029_s22, %s894_s11  ;;  %v225_v23 = vmul.f32 %v224_v17, %v165_v19 }
  0xb6   : > { %s1190_s19 = sld [smem:[#allocation27_spill]]  ;;  %s356_s8 = smul.f32 %s557_s26, %s896_s12 }
  0xb7   : > { %v277_v18 = vstv %s1188_s20  ;;  %s1054_s24 = sld [smem:[#allocation4 + $0x3b]] }
  0xb8   : > { %s355_s1 = sadd.f32 %s354_s5, %s353_s4  ;;  %s362_s16 = smul.f32 %s558_s6, %s896_s12  ;;  %v278_v21 = vadd.f32 %v277_v18, %v276_v16 }
  0xb9   : > { %s361_s15 = sadd.f32 %s360_s23, %s359_s2  ;;  %s368_s18 = smul.f32 %s1040_s27, %s896_s12 }
  0xba   : > { %s357_s30 = sadd.f32 %s356_s8, %s355_s1  ;;  %v279_v27 = vmul.f32 %v278_v21, %v165_v19 }
  0xbb   : > { %1189 = sst [smem:[#allocation23_spill]] %s1049_s14 }
  0xbc   : > { %s1192_s20 = sld [smem:[#allocation31_spill]]  ;;  %s358_s4 = smul.f32 %s994_s9, %s357_s30 }
  0xbd   : > { %1191 = sst [smem:[#allocation24_spill]] %s1054_s24  ;;  %s374_s24 = smul.f32 %s1046_s17, %s892_s10 }
  0xbe   : > { %s363_s22 = sadd.f32 %s362_s16, %s361_s15  ;;  %s370_s23 = smul.f32 %s997_s25, %s358_s4  ;;  %v380_v28 = vstv %s358_s4 }
  0xbf   : > { %s1193_s14 = sadd.f32 %s916_s29, %s1190_s19  ;;  %v381_v31 = vmul.f32 %v1010_v0, %v380_v28 }
  0xc0   : > { %s367_s5 = sadd.f32 %s366_s28, %s365_s7  ;;  %s364_s0 = smul.f32 %s994_s9, %s363_s22 }
  0xc1   : > { %v226_v24 = vstv %s1193_s14  ;;  %s1194_s26 = sld [smem:[#allocation23_spill]] }
  0xc2   : > { %s325_s2 = sadd.f32 %s916_s29, %s1019_s13  ;;  %v227_v29 = vadd.f32 %v226_v24, %v225_v23  ;;  %s372_s14 = smul.f32 %s1001_s3, %s364_s0  ;;  %v382_v32 = vstv %s364_s0 }
  0xc3   : > { %s1195_s6 = sld [smem:[#allocation24_spill]]  ;;  %v383_v33 = vmul.f32 %v1013_v1, %v382_v32 }
  0xc4   : > { %s369_s27 = sadd.f32 %s368_s18, %s367_s5  ;;  %v334_v36 = vstv %s325_s2  ;;  %v229_v38 = vsel %vm228_vm0, %v227_v29, 0.0 }
  0xc5   : > { %s1196_s1 = sadd.f32 %s916_s29, %s1192_s20  ;;  %v384_v37 = vadd.f32 %v383_v33, %v381_v31  ;;  %v335_v40 = vadd.f32 %v334_v36, %v333_v34 }
  0xc6   : > { %s371_s21 = ssub.f32 %s369_s27, %s370_s23 }
  0xc7   : > { %v280_v30 = vstv %s1196_s1  ;;  %s1197_s13 = sld [smem:[#allocation22_spill]]  ;;  %s375_s7 = smul.f32 %s1194_s26, %s894_s11 }
  0xc8   : > { %v281_v35 = vadd.f32 %v280_v30, %v279_v27  ;;  %s373_s25 = ssub.f32 %s371_s21, %s372_s14 }
  0xc9   : > { %s377_s9 = smul.f32 %s1195_s6, %s896_s12  ;;  %s1198_s3 = sld [smem:[#allocation15_spill]] }
  0xca   : > { %s376_s19 = sadd.f32 %s375_s7, %s374_s24  ;;  %v385_v39 = vstv %s373_s25  ;;  %v283_v42 = vsel %vm282_vm1, %v281_v35, %v229_v38 }
  0xcb   : > { %v386_v41 = vadd.f32 %v385_v39, %v384_v37  ;;  %v337_v44 = vsel %vm336_vm2, %v335_v40, %v283_v42  ;;  %s1200_s30 = sld [smem:[#allocation33_spill]] }
  0xcc   : > { %s378_s28 = sadd.f32 %s377_s9, %s376_s19 }
  0xcd   : > { %s497_s8 = sshll.u32 %s1197_s13, 3  ;;  %v387_v43 = vmul.f32 %v386_v41, %v165_v19  ;;  %s397_s20 = scalar_lea.sflag [#allocation7], %s1197_s13 }
  0xce   : > { %s379_s11 = sadd.f32 %s916_s29, %s378_s28  ;;  %s158_s10 = scalar_lea.vmem [#allocation8], %s497_s8 }
  0xcf   : > { %s564_s15 = sshll.u32 %s1198_s3, 7  ;;  %s410_s17 = sshll.u32 %s158_s10, 4  ;;  %s411_s17 = int_to_ptr.vmem [resolvable:$true] %s410_s17 }
  0xd0   : > { %v388_v45 = vstv %s379_s11  ;;  %s683_s22 = scalar_lea.vmem %s411_s17, 128  ;;  %s773_s29 = smov [#allocation8]  }
  0xd1   : > { %v389_v46 = vadd.f32 %v388_v45, %v387_v43  ;;  %s408_s18 = scalar_lea.hbm %s1200_s30, %s564_s15  ;;  %p684_p13 = scmp.ne.s32.totalorder %s411_s17, %s683_s22 }
  0xd2   : > { %s687_s4 = sshll.u32 %s773_s29, 4  ;;  %s688_s4 = int_to_ptr.vmem [resolvable:$false] %s687_s4 }
  0xd3   : > { %v391_v47 = vsel %vm390_vm3, %v389_v46, %v337_v44  ;;  %p685_p3 = pnand %p684_p13, %p851_p0  ;;  %s689_s5 = scalar_lea.vmem %s688_s4, 256 }
  0xd4   : > { %v392_v48 = vmul.f32 %v391_v47, %v391_v47  ;;  %p690_p7 = scmp.lt.s32.totalorder %s411_s17, %s688_s4  ;;  %p691_p8 = scmp.lt.s32.totalorder %s689_s5, %s683_s22 }
  0xd5   : > { %p686_p5 = pneg %p685_p3 }
  0xd6   : > { %395 = vst [vmem:[%s158_s10] sm:$0xff] %v392_v48  ;;  %p692_p10 = por %p691_p8, %p690_p7 }
  0xd8   : > { %p693_p11 = pnand %p692_p10, %p686_p5 }
  0xda   : > { %696 = shalt.err (!%p693_p11)
}
  0xdb   : > { %s697_s26 = scalar_lea.hbm %s408_s18, 128  ;;  %s701_s0 = scalar_lea.hbm %s1200_s30, 256 }
  0xdc   : > { %p698_p12 = scmp.ne.s32.totalorder %s408_s18, %s697_s26  ;;  %p702_p4 = scmp.lt.s32.totalorder %s408_s18, %s1200_s30 }
  0xdd   : > { %p703_p6 = scmp.lt.s32.totalorder %s701_s0, %s697_s26 }
  0xde   : > { %p699_p1 = pnand %p698_p12, %p851_p0 }
  0xdf   : > { %p704_p13 = por %p703_p6, %p702_p4 }
  0xe0   : > { %p700_p9 = pneg %p699_p1 }
  0xe2   : > { %p705_p3 = pnand %p704_p13, %p700_p9 }
  0xe4   : > { %708 = shalt.err (!%p705_p3)
}
  0xe5   : > { %569 = dma.vmem_to_hbm [thread:$0]  (%p851_p0), %s411_s17, 128, %s408_s18, %s397_s20  }
  0xe6 PF: > { %s1201_s1 = sld [smem:[#allocation12_spill]] }
  0xe7   : > { %s1203_s21 = sld [smem:[#allocation17_spill]] }
  0xec   : > { %s422_s13 = sand.u32 1, %s1201_s1  }
  0xed   : > { %p1204_p5 = scmp.ge.s32.totalorder %s1203_s21, 2  ;;  %s423_s7 = scalar_lea.sflag [#allocation7], %s422_s13 }
  0xef   : > { %p576_p7 = pnand %p1204_p5, %p858_p2 }
  0xf1   : > { %p577_p8 = pneg %p576_p7 }
  0xf3   : > { %740 = dma.done.wait (%p577_p8), %s423_s7, 128  }
  0xf4   : > { %742 = vsyncadd (%p577_p8), %s423_s7, 4294967168  ;;  %s27_s23 = sadd.s32 1, %s1203_s21   ;;  %s1205_s0 = sld [smem:[#allocation13_spill]] }
  0xf5   : > { %p24_p10 = scmp.ge.s32.totalorder %s27_s23, 4   ;;  %s1206_s1 = sld [smem:[#allocation14_spill]] }
  0xf6   : > { %s1207_s20 = sld [smem:[#allocation20_spill]] }
  0xf7   : > { %s1208_s21 = sld [smem:[#allocation16_spill]]  ;;  %26 = sbr.rel (!%p24_p10) target bundleno = 23 (0x17), region = 76 }
  0xf8   : > { %s1209_s22 = sld [smem:[#allocation18_spill]] }
  0xfc   :  { %428 = vsyncpa [#allocation6], 1 }
  0xfd   :  { %430 = vsyncpa [#allocation6 + $0x1], 1 }
  0xfe   :  { %431 = vsyncpa [#allocation7], 1 }
  0xff   :  { %433 = vsyncpa [#allocation7 + $0x1], 1 }

</bundles_post_ra>
